<compile_context>
chip_gen: v7x
topology: tpu7x:2x2x1
jax: 0.10.0
libtpu: 0.0.40
codegen_flags: <defaults>
</compile_context>

<pallas_src>
import math

import numpy as np
import jax
import jax.numpy as jnp
from jax.experimental import pallas as pl
from jax.experimental.pallas import tpu as pltpu

_HALF_LOG_2PI = 0.5 * math.log(2.0 * math.pi)

_LANE = 128                         # TPU lane width
_SUB = 8                            # TPU sublane count (f32)
_MAX_TBR = 256                      # hard cap: rows of 128 lanes per grid step
_TARGET_X_BYTES = 2 * 1024 * 1024   # ~2 MiB per (double-buffered) x tile


def _make_kernel(leaf_cols, n_sum, n_leaf, tbr, strip):
    """Bake the (static) SPN structure into the kernel body.

    leaf_cols : tuple of N*M Python ints -- compact (gathered) column per leaf
    n_sum     : number of SumNode children of the ProductNode
    n_leaf    : number of GaussianNode leaves per SumNode
    tbr       : rows of 128 lanes per grid step (block sublane extent)
    strip     : rows processed per inner-loop iteration (divides tbr)
    """
    n_strips = tbr // strip

    def kernel(mean_ref, inv_std_ref, bias_ref, x_ref, o_ref):
        # mean/inv_std/bias : (N*M,) f32 SMEM  (scalar-prefetched, grid-invariant)
        #   inv_std is pre-scaled by sqrt(0.5); bias = log(w) - log(std) - 0.5*log(2*pi)
        # x_ref : (U, TBR, 128) f32 VMEM   batch on lanes, unique features on axis 0
        # o_ref : (TBR, 128)    f32 VMEM   ProductNode output tile

        def strip_body(r0):
            total = jnp.zeros((strip, _LANE), jnp.float32)
            for n in range(n_sum):
                # GaussianNode leaves of this SumNode: s_k = logp_k + log(w_k)
                s_rows = []
                for mi in range(n_leaf):
                    k = n * n_leaf + mi
                    d = leaf_cols[k]                           # static -> free index
                    xd = x_ref[d, pl.ds(r0, strip), :]         # (strip, 128) dense
                    z = (xd - mean_ref[k]) * inv_std_ref[k]    # scalar bcast from SMEM
                    s_rows.append(bias_ref[k] - z * z)         # 0.5 folded into inv_std

                # SumNode: logsumexp over the M leaves, unrolled (VALU max / EUP exp).
                # NOTE: no -inf/NaN guard -- unreachable for finite x and finite
                # (mean, std > 0, w > 0) parameters.
                m = s_rows[0]
                for s in s_rows[1:]:
                    m = jnp.maximum(m, s)
                acc = jnp.exp(s_rows[0] - m)
                for s in s_rows[1:]:
                    acc = acc + jnp.exp(s - m)

                # ProductNode: sum over SumNode children.
                total = total + m + jnp.log(acc)

            o_ref[pl.ds(r0, strip), :] = total

        if n_strips == 1:
            strip_body(0)
        else:
            @pl.loop(0, n_strips)
            def _(si):
                strip_body(pl.multiple_of(si * strip, strip))

    return kernel


def product_node_forward(x, scopes, means, stds, weights):
    """ProductNode forward.

    x       : (B, D) float array
    scopes  : (N, M) Python/numpy ints  -- static SPN structure (leaf scopes)
    means   : (N, M) float              -- Gaussian means
    stds    : (N, M) float              -- Gaussian stds (> 0)
    weights : (N, M) float              -- SumNode mixture weights (unnormalized)
    returns : (B,) float32
    """
    scopes = np.asarray(scopes)
    n_sum, n_leaf = scopes.shape
    B, D = x.shape
    scopes_flat = scopes.reshape(-1).astype(np.int64)

    # Only move the feature columns the SPN actually reads (U <= min(D, N*M)).
    unique_cols, inv = np.unique(scopes_flat, return_inverse=True)
    U = int(unique_cols.shape[0])
    leaf_cols = tuple(int(c) for c in inv)      # leaf k -> compact column index
    identity_gather = (U == D) and np.array_equal(unique_cols, np.arange(D))

    # ---- tile geometry: batch on (sublane, lane) = (tbr, 128) per grid step ----
    rows_needed = -(-B // _LANE)                         # rows of 128 lanes
    rows8 = -(-rows_needed // _SUB) * _SUB               # rounded to sublane multiple

    bytes_per_row = U * _LANE * 4                        # f32 bytes per 128-lane row
    tbr_cap = max(_SUB, (_TARGET_X_BYTES // bytes_per_row) // _SUB * _SUB)
    tbr_cap = min(tbr_cap, _MAX_TBR)
    tbr = min(tbr_cap, rows8)
    # Keep >= 2 grid steps when the batch allows it (megacore sharding on v7x).
    if rows8 >= 2 * _SUB and -(-rows8 // tbr) < 2:
        half = -(-rows8 // 2)
        tbr = max(_SUB, -(-half // _SUB) * _SUB)

    grid_n = -(-rows8 // tbr)
    rows_total = grid_n * tbr
    b_pad = rows_total * _LANE

    # Inner strip size: keeps the per-iteration working set at <= 4 vregs/value.
    if tbr % 32 == 0:
        strip = 32
    elif tbr % 16 == 0:
        strip = 16
    else:
        strip = _SUB

    # ---- parameter folding (no per-element divide, no in-kernel log(std)) ----
    mean_v = jnp.asarray(means, jnp.float32).reshape(-1)
    std_v = jnp.asarray(stds, jnp.float32).reshape(-1)
    w_v = jnp.asarray(weights, jnp.float32).reshape(-1)
    inv_std_v = math.sqrt(0.5) / std_v                   # fold the 0.5 of -0.5*z^2
    bias_v = jnp.log(w_v) - jnp.log(std_v) - _HALF_LOG_2PI

    kernel = _make_kernel(leaf_cols, n_sum, n_leaf, tbr, strip)

    # Compiler params: batch axis is megacore-shardable; raise the scoped VMEM
    # limit only if a very wide U pushes the double-buffered footprint past ~24 MiB.
    x_buf = U * tbr * _LANE * 4
    o_buf = tbr * _LANE * 4
    vmem_needed = 2 * (x_buf + o_buf) + (1 << 20)
    cp_kwargs = dict(dimension_semantics=("parallel",))
    if vmem_needed > 24 * (1 << 20):
        cp_kwargs["vmem_limit_bytes"] = int(min(vmem_needed, 60 * (1 << 20)))

    call = pl.pallas_call(
        kernel,
        out_shape=jax.ShapeDtypeStruct((rows_total, _LANE), jnp.float32),
        grid_spec=pltpu.PrefetchScalarGridSpec(
            num_scalar_prefetch=3,                       # mean, inv_std, bias -> SMEM
            grid=(grid_n,),
            in_specs=[
                pl.BlockSpec((U, tbr, _LANE), lambda j, m, s, b: (0, j, 0)),  # x tile
            ],
            out_specs=pl.BlockSpec((tbr, _LANE), lambda j, m, s, b: (j, 0)),
        ),
        compiler_params=pltpu.CompilerParams(**cp_kwargs),
    )

    cols = jnp.asarray(unique_cols, jnp.int32)

    @jax.jit
    def run(x, mean_v, inv_std_v, bias_v):
        xg = jnp.asarray(x, jnp.float32)
        if not identity_gather:
            xg = xg[:, cols]                             # (B, U) -- only used columns
        if b_pad != B:
            xg = jnp.pad(xg, ((0, b_pad - B), (0, 0)))   # zero-fill padded lanes
        xt = xg.T.reshape(U, rows_total, _LANE)          # feature-major, lane-dense
        out = call(mean_v, inv_std_v, bias_v, xt)
        return out.reshape(-1)[:B]                       # == res.view(-1)

    return run(x, mean_v, inv_std_v, bias_v)


def _reference_forward(x, scopes, means, stds, weights):
    """Pure-JAX mirror of the torch ProductNode/SumNode/GaussianNode forward."""
    xg = jnp.asarray(x, jnp.float32)[:, np.asarray(scopes)]   # (B, N, M)
    logp = (
        -0.5 * ((xg - means[None]) / stds[None]) ** 2
        - jnp.log(stds[None])
        - _HALF_LOG_2PI
    )
    s = logp + jnp.log(weights)[None]
    lse = jax.scipy.special.logsumexp(s, axis=-1)              # SumNode
    return jnp.sum(lse, axis=-1).reshape(-1)                   # ProductNode


if __name__ == "__main__":
    # ProductNode with N=4 SumNode children, each with M=4 GaussianNode leaves,
    # over D=16 features, batch B=8.
    B, D, N, M = 8, 16, 4, 4

    key = jax.random.PRNGKey(0)
    kx, kmean, kstd, kw = jax.random.split(key, 4)

    x = jax.random.normal(kx, (B, D), dtype=jnp.float32)

    # Static SPN structure (scope is a plain Python int per node in the module).
    scopes = (np.arange(N * M, dtype=np.int64) % D).reshape(N, M)

    # Deterministic synthetic parameters.
    means = jax.random.normal(kmean, (N, M), dtype=jnp.float32)
    stds = jax.random.uniform(kstd, (N, M), dtype=jnp.float32, minval=0.5, maxval=1.5)
    weights = jax.random.uniform(kw, (N, M), dtype=jnp.float32, minval=0.1, maxval=1.0)

    out = product_node_forward(x, scopes, means, stds, weights)
    out = jax.block_until_ready(out)

    ref = _reference_forward(x, scopes, means, stds, weights)
    assert out.shape == (B,), out.shape
    assert jnp.allclose(out, ref, rtol=1e-5, atol=1e-5), (out, ref)

    print("KERNEL_OK")
</pallas_src>

<mosaic_0001>
module attributes {stable_mosaic.version = 11 : i64} {
  func.func @kernel(%arg0: i32, %arg1: memref<16xf32, #tpu.memory_space<smem>>, %arg2: memref<16xf32, #tpu.memory_space<smem>>, %arg3: memref<16xf32, #tpu.memory_space<smem>>, %arg4: memref<16x8x128xf32, #tpu.memory_space<vmem>>, %arg5: memref<8x128xf32, #tpu.memory_space<vmem>>) attributes {dimension_semantics = [#tpu.dimension_semantics<parallel>], iteration_bounds = array<i64: 1>, scalar_prefetch = 3 : i64, scratch_operands = 0 : i64, tpu.core_type = #tpu.core_type<tc>, window_params = [{transform_indices = @transform_0, window_bounds = array<i64: 16, 8, 128>}, {transform_indices = @transform_1, window_bounds = array<i64: 8, 128>}]} {
    %cst = arith.constant 0.000000e+00 : f32
    %0 = vector.broadcast %cst : f32 to vector<8x128xf32>
    %c0 = arith.constant 0 : index
    %c0_0 = arith.constant 0 : index
    %c0_1 = arith.constant 0 : index
    %1 = vector.load %arg4[%c0, %c0_0, %c0_1] : memref<16x8x128xf32, #tpu.memory_space<vmem>>, vector<1x8x128xf32>
    %2 = vector.shape_cast %1 : vector<1x8x128xf32> to vector<8x128xf32>
    %c0_2 = arith.constant 0 : index
    %3 = memref.load %arg1[%c0_2] : memref<16xf32, #tpu.memory_space<smem>>
    %4 = vector.broadcast %3 : f32 to vector<8x128xf32>
    %5 = arith.subf %2, %4 : vector<8x128xf32>
    %c0_3 = arith.constant 0 : index
    %6 = memref.load %arg2[%c0_3] : memref<16xf32, #tpu.memory_space<smem>>
    %7 = vector.broadcast %6 : f32 to vector<8x128xf32>
    %8 = arith.mulf %5, %7 : vector<8x128xf32>
    %c0_4 = arith.constant 0 : index
    %9 = memref.load %arg3[%c0_4] : memref<16xf32, #tpu.memory_space<smem>>
    %10 = arith.mulf %8, %8 : vector<8x128xf32>
    %11 = vector.broadcast %9 : f32 to vector<8x128xf32>
    %12 = arith.subf %11, %10 : vector<8x128xf32>
    %c1 = arith.constant 1 : index
    %c0_5 = arith.constant 0 : index
    %c0_6 = arith.constant 0 : index
    %13 = vector.load %arg4[%c1, %c0_5, %c0_6] : memref<16x8x128xf32, #tpu.memory_space<vmem>>, vector<1x8x128xf32>
    %14 = vector.shape_cast %13 : vector<1x8x128xf32> to vector<8x128xf32>
    %c1_7 = arith.constant 1 : index
    %15 = memref.load %arg1[%c1_7] : memref<16xf32, #tpu.memory_space<smem>>
    %16 = vector.broadcast %15 : f32 to vector<8x128xf32>
    %17 = arith.subf %14, %16 : vector<8x128xf32>
    %c1_8 = arith.constant 1 : index
    %18 = memref.load %arg2[%c1_8] : memref<16xf32, #tpu.memory_space<smem>>
    %19 = vector.broadcast %18 : f32 to vector<8x128xf32>
    %20 = arith.mulf %17, %19 : vector<8x128xf32>
    %c1_9 = arith.constant 1 : index
    %21 = memref.load %arg3[%c1_9] : memref<16xf32, #tpu.memory_space<smem>>
    %22 = arith.mulf %20, %20 : vector<8x128xf32>
    %23 = vector.broadcast %21 : f32 to vector<8x128xf32>
    %24 = arith.subf %23, %22 : vector<8x128xf32>
    %c2 = arith.constant 2 : index
    %c0_10 = arith.constant 0 : index
    %c0_11 = arith.constant 0 : index
    %25 = vector.load %arg4[%c2, %c0_10, %c0_11] : memref<16x8x128xf32, #tpu.memory_space<vmem>>, vector<1x8x128xf32>
    %26 = vector.shape_cast %25 : vector<1x8x128xf32> to vector<8x128xf32>
    %c2_12 = arith.constant 2 : index
    %27 = memref.load %arg1[%c2_12] : memref<16xf32, #tpu.memory_space<smem>>
    %28 = vector.broadcast %27 : f32 to vector<8x128xf32>
    %29 = arith.subf %26, %28 : vector<8x128xf32>
    %c2_13 = arith.constant 2 : index
    %30 = memref.load %arg2[%c2_13] : memref<16xf32, #tpu.memory_space<smem>>
    %31 = vector.broadcast %30 : f32 to vector<8x128xf32>
    %32 = arith.mulf %29, %31 : vector<8x128xf32>
    %c2_14 = arith.constant 2 : index
    %33 = memref.load %arg3[%c2_14] : memref<16xf32, #tpu.memory_space<smem>>
    %34 = arith.mulf %32, %32 : vector<8x128xf32>
    %35 = vector.broadcast %33 : f32 to vector<8x128xf32>
    %36 = arith.subf %35, %34 : vector<8x128xf32>
    %c3 = arith.constant 3 : index
    %c0_15 = arith.constant 0 : index
    %c0_16 = arith.constant 0 : index
    %37 = vector.load %arg4[%c3, %c0_15, %c0_16] : memref<16x8x128xf32, #tpu.memory_space<vmem>>, vector<1x8x128xf32>
    %38 = vector.shape_cast %37 : vector<1x8x128xf32> to vector<8x128xf32>
    %c3_17 = arith.constant 3 : index
    %39 = memref.load %arg1[%c3_17] : memref<16xf32, #tpu.memory_space<smem>>
    %40 = vector.broadcast %39 : f32 to vector<8x128xf32>
    %41 = arith.subf %38, %40 : vector<8x128xf32>
    %c3_18 = arith.constant 3 : index
    %42 = memref.load %arg2[%c3_18] : memref<16xf32, #tpu.memory_space<smem>>
    %43 = vector.broadcast %42 : f32 to vector<8x128xf32>
    %44 = arith.mulf %41, %43 : vector<8x128xf32>
    %c3_19 = arith.constant 3 : index
    %45 = memref.load %arg3[%c3_19] : memref<16xf32, #tpu.memory_space<smem>>
    %46 = arith.mulf %44, %44 : vector<8x128xf32>
    %47 = vector.broadcast %45 : f32 to vector<8x128xf32>
    %48 = arith.subf %47, %46 : vector<8x128xf32>
    %49 = arith.maximumf %12, %24 : vector<8x128xf32>
    %50 = arith.maximumf %49, %36 : vector<8x128xf32>
    %51 = arith.maximumf %50, %48 : vector<8x128xf32>
    %52 = arith.subf %12, %51 : vector<8x128xf32>
    %53 = math.exp %52 : vector<8x128xf32>
    %54 = arith.subf %24, %51 : vector<8x128xf32>
    %55 = math.exp %54 : vector<8x128xf32>
    %56 = arith.addf %53, %55 : vector<8x128xf32>
    %57 = arith.subf %36, %51 : vector<8x128xf32>
    %58 = math.exp %57 : vector<8x128xf32>
    %59 = arith.addf %56, %58 : vector<8x128xf32>
    %60 = arith.subf %48, %51 : vector<8x128xf32>
    %61 = math.exp %60 : vector<8x128xf32>
    %62 = arith.addf %59, %61 : vector<8x128xf32>
    %63 = arith.addf %0, %51 : vector<8x128xf32>
    %64 = math.log %62 : vector<8x128xf32>
    %65 = arith.addf %63, %64 : vector<8x128xf32>
    %c4 = arith.constant 4 : index
    %c0_20 = arith.constant 0 : index
    %c0_21 = arith.constant 0 : index
    %66 = vector.load %arg4[%c4, %c0_20, %c0_21] : memref<16x8x128xf32, #tpu.memory_space<vmem>>, vector<1x8x128xf32>
    %67 = vector.shape_cast %66 : vector<1x8x128xf32> to vector<8x128xf32>
    %c4_22 = arith.constant 4 : index
    %68 = memref.load %arg1[%c4_22] : memref<16xf32, #tpu.memory_space<smem>>
    %69 = vector.broadcast %68 : f32 to vector<8x128xf32>
    %70 = arith.subf %67, %69 : vector<8x128xf32>
    %c4_23 = arith.constant 4 : index
    %71 = memref.load %arg2[%c4_23] : memref<16xf32, #tpu.memory_space<smem>>
    %72 = vector.broadcast %71 : f32 to vector<8x128xf32>
    %73 = arith.mulf %70, %72 : vector<8x128xf32>
    %c4_24 = arith.constant 4 : index
    %74 = memref.load %arg3[%c4_24] : memref<16xf32, #tpu.memory_space<smem>>
    %75 = arith.mulf %73, %73 : vector<8x128xf32>
    %76 = vector.broadcast %74 : f32 to vector<8x128xf32>
    %77 = arith.subf %76, %75 : vector<8x128xf32>
    %c5 = arith.constant 5 : index
    %c0_25 = arith.constant 0 : index
    %c0_26 = arith.constant 0 : index
    %78 = vector.load %arg4[%c5, %c0_25, %c0_26] : memref<16x8x128xf32, #tpu.memory_space<vmem>>, vector<1x8x128xf32>
    %79 = vector.shape_cast %78 : vector<1x8x128xf32> to vector<8x128xf32>
    %c5_27 = arith.constant 5 : index
    %80 = memref.load %arg1[%c5_27] : memref<16xf32, #tpu.memory_space<smem>>
    %81 = vector.broadcast %80 : f32 to vector<8x128xf32>
    %82 = arith.subf %79, %81 : vector<8x128xf32>
    %c5_28 = arith.constant 5 : index
    %83 = memref.load %arg2[%c5_28] : memref<16xf32, #tpu.memory_space<smem>>
    %84 = vector.broadcast %83 : f32 to vector<8x128xf32>
    %85 = arith.mulf %82, %84 : vector<8x128xf32>
    %c5_29 = arith.constant 5 : index
    %86 = memref.load %arg3[%c5_29] : memref<16xf32, #tpu.memory_space<smem>>
    %87 = arith.mulf %85, %85 : vector<8x128xf32>
    %88 = vector.broadcast %86 : f32 to vector<8x128xf32>
    %89 = arith.subf %88, %87 : vector<8x128xf32>
    %c6 = arith.constant 6 : index
    %c0_30 = arith.constant 0 : index
    %c0_31 = arith.constant 0 : index
    %90 = vector.load %arg4[%c6, %c0_30, %c0_31] : memref<16x8x128xf32, #tpu.memory_space<vmem>>, vector<1x8x128xf32>
    %91 = vector.shape_cast %90 : vector<1x8x128xf32> to vector<8x128xf32>
    %c6_32 = arith.constant 6 : index
    %92 = memref.load %arg1[%c6_32] : memref<16xf32, #tpu.memory_space<smem>>
    %93 = vector.broadcast %92 : f32 to vector<8x128xf32>
    %94 = arith.subf %91, %93 : vector<8x128xf32>
    %c6_33 = arith.constant 6 : index
    %95 = memref.load %arg2[%c6_33] : memref<16xf32, #tpu.memory_space<smem>>
    %96 = vector.broadcast %95 : f32 to vector<8x128xf32>
    %97 = arith.mulf %94, %96 : vector<8x128xf32>
    %c6_34 = arith.constant 6 : index
    %98 = memref.load %arg3[%c6_34] : memref<16xf32, #tpu.memory_space<smem>>
    %99 = arith.mulf %97, %97 : vector<8x128xf32>
    %100 = vector.broadcast %98 : f32 to vector<8x128xf32>
    %101 = arith.subf %100, %99 : vector<8x128xf32>
    %c7 = arith.constant 7 : index
    %c0_35 = arith.constant 0 : index
    %c0_36 = arith.constant 0 : index
    %102 = vector.load %arg4[%c7, %c0_35, %c0_36] : memref<16x8x128xf32, #tpu.memory_space<vmem>>, vector<1x8x128xf32>
    %103 = vector.shape_cast %102 : vector<1x8x128xf32> to vector<8x128xf32>
    %c7_37 = arith.constant 7 : index
    %104 = memref.load %arg1[%c7_37] : memref<16xf32, #tpu.memory_space<smem>>
    %105 = vector.broadcast %104 : f32 to vector<8x128xf32>
    %106 = arith.subf %103, %105 : vector<8x128xf32>
    %c7_38 = arith.constant 7 : index
    %107 = memref.load %arg2[%c7_38] : memref<16xf32, #tpu.memory_space<smem>>
    %108 = vector.broadcast %107 : f32 to vector<8x128xf32>
    %109 = arith.mulf %106, %108 : vector<8x128xf32>
    %c7_39 = arith.constant 7 : index
    %110 = memref.load %arg3[%c7_39] : memref<16xf32, #tpu.memory_space<smem>>
    %111 = arith.mulf %109, %109 : vector<8x128xf32>
    %112 = vector.broadcast %110 : f32 to vector<8x128xf32>
    %113 = arith.subf %112, %111 : vector<8x128xf32>
    %114 = arith.maximumf %77, %89 : vector<8x128xf32>
    %115 = arith.maximumf %114, %101 : vector<8x128xf32>
    %116 = arith.maximumf %115, %113 : vector<8x128xf32>
    %117 = arith.subf %77, %116 : vector<8x128xf32>
    %118 = math.exp %117 : vector<8x128xf32>
    %119 = arith.subf %89, %116 : vector<8x128xf32>
    %120 = math.exp %119 : vector<8x128xf32>
    %121 = arith.addf %118, %120 : vector<8x128xf32>
    %122 = arith.subf %101, %116 : vector<8x128xf32>
    %123 = math.exp %122 : vector<8x128xf32>
    %124 = arith.addf %121, %123 : vector<8x128xf32>
    %125 = arith.subf %113, %116 : vector<8x128xf32>
    %126 = math.exp %125 : vector<8x128xf32>
    %127 = arith.addf %124, %126 : vector<8x128xf32>
    %128 = arith.addf %65, %116 : vector<8x128xf32>
    %129 = math.log %127 : vector<8x128xf32>
    %130 = arith.addf %128, %129 : vector<8x128xf32>
    %c8 = arith.constant 8 : index
    %c0_40 = arith.constant 0 : index
    %c0_41 = arith.constant 0 : index
    %131 = vector.load %arg4[%c8, %c0_40, %c0_41] : memref<16x8x128xf32, #tpu.memory_space<vmem>>, vector<1x8x128xf32>
    %132 = vector.shape_cast %131 : vector<1x8x128xf32> to vector<8x128xf32>
    %c8_42 = arith.constant 8 : index
    %133 = memref.load %arg1[%c8_42] : memref<16xf32, #tpu.memory_space<smem>>
    %134 = vector.broadcast %133 : f32 to vector<8x128xf32>
    %135 = arith.subf %132, %134 : vector<8x128xf32>
    %c8_43 = arith.constant 8 : index
    %136 = memref.load %arg2[%c8_43] : memref<16xf32, #tpu.memory_space<smem>>
    %137 = vector.broadcast %136 : f32 to vector<8x128xf32>
    %138 = arith.mulf %135, %137 : vector<8x128xf32>
    %c8_44 = arith.constant 8 : index
    %139 = memref.load %arg3[%c8_44] : memref<16xf32, #tpu.memory_space<smem>>
    %140 = arith.mulf %138, %138 : vector<8x128xf32>
    %141 = vector.broadcast %139 : f32 to vector<8x128xf32>
    %142 = arith.subf %141, %140 : vector<8x128xf32>
    %c9 = arith.constant 9 : index
    %c0_45 = arith.constant 0 : index
    %c0_46 = arith.constant 0 : index
    %143 = vector.load %arg4[%c9, %c0_45, %c0_46] : memref<16x8x128xf32, #tpu.memory_space<vmem>>, vector<1x8x128xf32>
    %144 = vector.shape_cast %143 : vector<1x8x128xf32> to vector<8x128xf32>
    %c9_47 = arith.constant 9 : index
    %145 = memref.load %arg1[%c9_47] : memref<16xf32, #tpu.memory_space<smem>>
    %146 = vector.broadcast %145 : f32 to vector<8x128xf32>
    %147 = arith.subf %144, %146 : vector<8x128xf32>
    %c9_48 = arith.constant 9 : index
    %148 = memref.load %arg2[%c9_48] : memref<16xf32, #tpu.memory_space<smem>>
    %149 = vector.broadcast %148 : f32 to vector<8x128xf32>
    %150 = arith.mulf %147, %149 : vector<8x128xf32>
    %c9_49 = arith.constant 9 : index
    %151 = memref.load %arg3[%c9_49] : memref<16xf32, #tpu.memory_space<smem>>
    %152 = arith.mulf %150, %150 : vector<8x128xf32>
    %153 = vector.broadcast %151 : f32 to vector<8x128xf32>
    %154 = arith.subf %153, %152 : vector<8x128xf32>
    %c10 = arith.constant 10 : index
    %c0_50 = arith.constant 0 : index
    %c0_51 = arith.constant 0 : index
    %155 = vector.load %arg4[%c10, %c0_50, %c0_51] : memref<16x8x128xf32, #tpu.memory_space<vmem>>, vector<1x8x128xf32>
    %156 = vector.shape_cast %155 : vector<1x8x128xf32> to vector<8x128xf32>
    %c10_52 = arith.constant 10 : index
    %157 = memref.load %arg1[%c10_52] : memref<16xf32, #tpu.memory_space<smem>>
    %158 = vector.broadcast %157 : f32 to vector<8x128xf32>
    %159 = arith.subf %156, %158 : vector<8x128xf32>
    %c10_53 = arith.constant 10 : index
    %160 = memref.load %arg2[%c10_53] : memref<16xf32, #tpu.memory_space<smem>>
    %161 = vector.broadcast %160 : f32 to vector<8x128xf32>
    %162 = arith.mulf %159, %161 : vector<8x128xf32>
    %c10_54 = arith.constant 10 : index
    %163 = memref.load %arg3[%c10_54] : memref<16xf32, #tpu.memory_space<smem>>
    %164 = arith.mulf %162, %162 : vector<8x128xf32>
    %165 = vector.broadcast %163 : f32 to vector<8x128xf32>
    %166 = arith.subf %165, %164 : vector<8x128xf32>
    %c11 = arith.constant 11 : index
    %c0_55 = arith.constant 0 : index
    %c0_56 = arith.constant 0 : index
    %167 = vector.load %arg4[%c11, %c0_55, %c0_56] : memref<16x8x128xf32, #tpu.memory_space<vmem>>, vector<1x8x128xf32>
    %168 = vector.shape_cast %167 : vector<1x8x128xf32> to vector<8x128xf32>
    %c11_57 = arith.constant 11 : index
    %169 = memref.load %arg1[%c11_57] : memref<16xf32, #tpu.memory_space<smem>>
    %170 = vector.broadcast %169 : f32 to vector<8x128xf32>
    %171 = arith.subf %168, %170 : vector<8x128xf32>
    %c11_58 = arith.constant 11 : index
    %172 = memref.load %arg2[%c11_58] : memref<16xf32, #tpu.memory_space<smem>>
    %173 = vector.broadcast %172 : f32 to vector<8x128xf32>
    %174 = arith.mulf %171, %173 : vector<8x128xf32>
    %c11_59 = arith.constant 11 : index
    %175 = memref.load %arg3[%c11_59] : memref<16xf32, #tpu.memory_space<smem>>
    %176 = arith.mulf %174, %174 : vector<8x128xf32>
    %177 = vector.broadcast %175 : f32 to vector<8x128xf32>
    %178 = arith.subf %177, %176 : vector<8x128xf32>
    %179 = arith.maximumf %142, %154 : vector<8x128xf32>
    %180 = arith.maximumf %179, %166 : vector<8x128xf32>
    %181 = arith.maximumf %180, %178 : vector<8x128xf32>
    %182 = arith.subf %142, %181 : vector<8x128xf32>
    %183 = math.exp %182 : vector<8x128xf32>
    %184 = arith.subf %154, %181 : vector<8x128xf32>
    %185 = math.exp %184 : vector<8x128xf32>
    %186 = arith.addf %183, %185 : vector<8x128xf32>
    %187 = arith.subf %166, %181 : vector<8x128xf32>
    %188 = math.exp %187 : vector<8x128xf32>
    %189 = arith.addf %186, %188 : vector<8x128xf32>
    %190 = arith.subf %178, %181 : vector<8x128xf32>
    %191 = math.exp %190 : vector<8x128xf32>
    %192 = arith.addf %189, %191 : vector<8x128xf32>
    %193 = arith.addf %130, %181 : vector<8x128xf32>
    %194 = math.log %192 : vector<8x128xf32>
    %195 = arith.addf %193, %194 : vector<8x128xf32>
    %c12 = arith.constant 12 : index
    %c0_60 = arith.constant 0 : index
    %c0_61 = arith.constant 0 : index
    %196 = vector.load %arg4[%c12, %c0_60, %c0_61] : memref<16x8x128xf32, #tpu.memory_space<vmem>>, vector<1x8x128xf32>
    %197 = vector.shape_cast %196 : vector<1x8x128xf32> to vector<8x128xf32>
    %c12_62 = arith.constant 12 : index
    %198 = memref.load %arg1[%c12_62] : memref<16xf32, #tpu.memory_space<smem>>
    %199 = vector.broadcast %198 : f32 to vector<8x128xf32>
    %200 = arith.subf %197, %199 : vector<8x128xf32>
    %c12_63 = arith.constant 12 : index
    %201 = memref.load %arg2[%c12_63] : memref<16xf32, #tpu.memory_space<smem>>
    %202 = vector.broadcast %201 : f32 to vector<8x128xf32>
    %203 = arith.mulf %200, %202 : vector<8x128xf32>
    %c12_64 = arith.constant 12 : index
    %204 = memref.load %arg3[%c12_64] : memref<16xf32, #tpu.memory_space<smem>>
    %205 = arith.mulf %203, %203 : vector<8x128xf32>
    %206 = vector.broadcast %204 : f32 to vector<8x128xf32>
    %207 = arith.subf %206, %205 : vector<8x128xf32>
    %c13 = arith.constant 13 : index
    %c0_65 = arith.constant 0 : index
    %c0_66 = arith.constant 0 : index
    %208 = vector.load %arg4[%c13, %c0_65, %c0_66] : memref<16x8x128xf32, #tpu.memory_space<vmem>>, vector<1x8x128xf32>
    %209 = vector.shape_cast %208 : vector<1x8x128xf32> to vector<8x128xf32>
    %c13_67 = arith.constant 13 : index
    %210 = memref.load %arg1[%c13_67] : memref<16xf32, #tpu.memory_space<smem>>
    %211 = vector.broadcast %210 : f32 to vector<8x128xf32>
    %212 = arith.subf %209, %211 : vector<8x128xf32>
    %c13_68 = arith.constant 13 : index
    %213 = memref.load %arg2[%c13_68] : memref<16xf32, #tpu.memory_space<smem>>
    %214 = vector.broadcast %213 : f32 to vector<8x128xf32>
    %215 = arith.mulf %212, %214 : vector<8x128xf32>
    %c13_69 = arith.constant 13 : index
    %216 = memref.load %arg3[%c13_69] : memref<16xf32, #tpu.memory_space<smem>>
    %217 = arith.mulf %215, %215 : vector<8x128xf32>
    %218 = vector.broadcast %216 : f32 to vector<8x128xf32>
    %219 = arith.subf %218, %217 : vector<8x128xf32>
    %c14 = arith.constant 14 : index
    %c0_70 = arith.constant 0 : index
    %c0_71 = arith.constant 0 : index
    %220 = vector.load %arg4[%c14, %c0_70, %c0_71] : memref<16x8x128xf32, #tpu.memory_space<vmem>>, vector<1x8x128xf32>
    %221 = vector.shape_cast %220 : vector<1x8x128xf32> to vector<8x128xf32>
    %c14_72 = arith.constant 14 : index
    %222 = memref.load %arg1[%c14_72] : memref<16xf32, #tpu.memory_space<smem>>
    %223 = vector.broadcast %222 : f32 to vector<8x128xf32>
    %224 = arith.subf %221, %223 : vector<8x128xf32>
    %c14_73 = arith.constant 14 : index
    %225 = memref.load %arg2[%c14_73] : memref<16xf32, #tpu.memory_space<smem>>
    %226 = vector.broadcast %225 : f32 to vector<8x128xf32>
    %227 = arith.mulf %224, %226 : vector<8x128xf32>
    %c14_74 = arith.constant 14 : index
    %228 = memref.load %arg3[%c14_74] : memref<16xf32, #tpu.memory_space<smem>>
    %229 = arith.mulf %227, %227 : vector<8x128xf32>
    %230 = vector.broadcast %228 : f32 to vector<8x128xf32>
    %231 = arith.subf %230, %229 : vector<8x128xf32>
    %c15 = arith.constant 15 : index
    %c0_75 = arith.constant 0 : index
    %c0_76 = arith.constant 0 : index
    %232 = vector.load %arg4[%c15, %c0_75, %c0_76] : memref<16x8x128xf32, #tpu.memory_space<vmem>>, vector<1x8x128xf32>
    %233 = vector.shape_cast %232 : vector<1x8x128xf32> to vector<8x128xf32>
    %c15_77 = arith.constant 15 : index
    %234 = memref.load %arg1[%c15_77] : memref<16xf32, #tpu.memory_space<smem>>
    %235 = vector.broadcast %234 : f32 to vector<8x128xf32>
    %236 = arith.subf %233, %235 : vector<8x128xf32>
    %c15_78 = arith.constant 15 : index
    %237 = memref.load %arg2[%c15_78] : memref<16xf32, #tpu.memory_space<smem>>
    %238 = vector.broadcast %237 : f32 to vector<8x128xf32>
    %239 = arith.mulf %236, %238 : vector<8x128xf32>
    %c15_79 = arith.constant 15 : index
    %240 = memref.load %arg3[%c15_79] : memref<16xf32, #tpu.memory_space<smem>>
    %241 = arith.mulf %239, %239 : vector<8x128xf32>
    %242 = vector.broadcast %240 : f32 to vector<8x128xf32>
    %243 = arith.subf %242, %241 : vector<8x128xf32>
    %244 = arith.maximumf %207, %219 : vector<8x128xf32>
    %245 = arith.maximumf %244, %231 : vector<8x128xf32>
    %246 = arith.maximumf %245, %243 : vector<8x128xf32>
    %247 = arith.subf %207, %246 : vector<8x128xf32>
    %248 = math.exp %247 : vector<8x128xf32>
    %249 = arith.subf %219, %246 : vector<8x128xf32>
    %250 = math.exp %249 : vector<8x128xf32>
    %251 = arith.addf %248, %250 : vector<8x128xf32>
    %252 = arith.subf %231, %246 : vector<8x128xf32>
    %253 = math.exp %252 : vector<8x128xf32>
    %254 = arith.addf %251, %253 : vector<8x128xf32>
    %255 = arith.subf %243, %246 : vector<8x128xf32>
    %256 = math.exp %255 : vector<8x128xf32>
    %257 = arith.addf %254, %256 : vector<8x128xf32>
    %258 = arith.addf %195, %246 : vector<8x128xf32>
    %259 = math.log %257 : vector<8x128xf32>
    %260 = arith.addf %258, %259 : vector<8x128xf32>
    %c0_80 = arith.constant 0 : index
    %c0_81 = arith.constant 0 : index
    %261 = vector.load %arg5[%c0_80, %c0_81] : memref<8x128xf32, #tpu.memory_space<vmem>>, vector<8x128xf32>
    tpu.vector_store %arg5[%c0_80, %c0_81], %260 {strides = array<i32>} : memref<8x128xf32, #tpu.memory_space<vmem>>, vector<8x128xf32>,
    return
  }
  func.func @transform_0(%arg0: i32, %arg1: memref<16xf32, #tpu.memory_space<smem>>, %arg2: memref<16xf32, #tpu.memory_space<smem>>, %arg3: memref<16xf32, #tpu.memory_space<smem>>) -> (i32, i32, i32) {
    %c0_i32 = arith.constant 0 : i32
    %c0_i32_0 = arith.constant 0 : i32
    %c0_i32_1 = arith.constant 0 : i32
    return %c0_i32, %arg0, %c0_i32_0 : i32, i32, i32
  }
  func.func @transform_1(%arg0: i32, %arg1: memref<16xf32, #tpu.memory_space<smem>>, %arg2: memref<16xf32, #tpu.memory_space<smem>>, %arg3: memref<16xf32, #tpu.memory_space<smem>>) -> (i32, i32) {
    %c0_i32 = arith.constant 0 : i32
    %c0_i32_0 = arith.constant 0 : i32
    return %arg0, %c0_i32 : i32, i32
  }
}

</mosaic_0001>

<bundles_post_ra>
// kernel: run.1
= control target key start
LH: loop header
LB: loop body
LE: loop exit
PB: predicated region body
PF: predicated region fallthrough
CT: control target
= control target key end

     0   :  { %s699_s0 = inlined_call_operand.vmem [shape: f32[16], index: 0, kind: input, shape index: {}]   ;;  %s700_s3 = inlined_call_operand.vmem [shape: f32[16,8,128], index: 3, kind: input, shape index: {}]   ;;  %s701_s4 = inlined_call_operand.vmem [shape: f32[8,128], index: 4, kind: output, shape index: {}]   ;;  %s702_s1 = inlined_call_operand.vmem [shape: f32[16], index: 1, kind: input, shape index: {}]   ;;  %s703_s2 = inlined_call_operand.vmem [shape: f32[16], index: 2, kind: input, shape index: {}]  }
   0x1   :  { %s9_s17 = sshll.u32 %s699_s0, 4  ;;  %s13_s20 = sshll.u32 %s702_s1, 4  ;;  %s10_s17 = int_to_ptr.vmem [resolvable:$true] %s9_s17  ;;  %s14_s20 = int_to_ptr.vmem [resolvable:$true] %s13_s20 }
   0x2   :  { %s412_s21 = scalar_lea.vmem %s10_s17, 16  ;;  %p417_p1 = scmp.lt.s32.totalorder %s10_s17, %s10_s17 }
   0x3   :  { %p413_p0 = scmp.ne.s32.totalorder %s10_s17, %s412_s21  ;;  %p418_p2 = scmp.lt.s32.totalorder %s412_s21, %s412_s21 }
   0x5   :  { %p419_p3 = por %p418_p2, %p417_p1 }
   0x7   :  { %p420_p4 = pnand %p419_p3, %p413_p0 }
   0x9   :  { %423 = shalt.err (!%p420_p4)  }
   0xa   :  { %s450_s22 = smov [#allocation3]   ;;  %s424_s23 = scalar_lea.vmem %s14_s20, 16 }
   0xb   :  { %12 = dma.vmem_to_smem %s10_s17, 16, %s450_s22, [#allocation2] }
   0xc   :  { %p425_p5 = scmp.ne.s32.totalorder %s14_s20, %s424_s23  ;;  %p429_p6 = scmp.lt.s32.totalorder %s14_s20, %s14_s20 }
   0xd   :  { %p430_p7 = scmp.lt.s32.totalorder %s424_s23, %s424_s23 }
   0xf   :  { %p431_p8 = por %p430_p7, %p429_p6 }
  0x11   :  { %p432_p9 = pnand %p431_p8, %p425_p5 }
  0x13   :  { %435 = shalt.err (!%p432_p9)  }
  0x14   :  { %s451_s0 = smov [#allocation4]   ;;  %s17_s25 = sshll.u32 %s703_s2, 4  ;;  %s18_s25 = int_to_ptr.vmem [resolvable:$true] %s17_s25 }
  0x15   :  { %16 = dma.vmem_to_smem %s14_s20, 16, %s451_s0, [#allocation2] }
  0x16   :  { %s436_s26 = scalar_lea.vmem %s18_s25, 16  ;;  %p441_p11 = scmp.lt.s32.totalorder %s18_s25, %s18_s25 }
  0x17   :  { %p437_p10 = scmp.ne.s32.totalorder %s18_s25, %s436_s26  ;;  %p442_p12 = scmp.lt.s32.totalorder %s436_s26, %s436_s26 }
  0x19   :  { %p443_p13 = por %p442_p12, %p441_p11 }
  0x1b   :  { %p444_p0 = pnand %p443_p13, %p437_p10 }
  0x1d   :  { %447 = shalt.err (!%p444_p0)  }
  0x1e   :  { %s452_s27 = smov [#allocation5]  }
  0x1f   :  { %20 = dma.vmem_to_smem %s18_s25, 16, %s452_s27, [#allocation2] }
  0x20   :  { %448 = dma.done.wait [#allocation2], 48 }
  0x21   :  { %449 = vsyncadd [#allocation2], 4294967248 }
  0x22   :  { %22 = sfence }
  0x23   :  { %s26_s28 = sld [smem:[#allocation3]]  ;;  %s310_s5 = sld [smem:[#allocation3 + $0x1]]  ;;  %v25_v0 = vld [vmem:[%s700_s3] sm:$0xff]  ;;  %v309_v1 = vld [vmem:[%s700_s3 + $0x8] sm:$0xff]  ;;  %v313_v6 = vld [vmem:[%s700_s3 + $0x10] sm:$0xff] }
  0x24   :  { %s29_s29 = sld [smem:[#allocation4]]  ;;  %s489_s6 = sld [smem:[#allocation4 + $0x1]]  ;;  %v317_v10 = vld [vmem:[%s700_s3 + $0x18] sm:$0xff]  ;;  %v321_v19 = vld [vmem:[%s700_s3 + $0x20] sm:$0xff]  ;;  %v325_v28 = vld [vmem:[%s700_s3 + $0x28] sm:$0xff] }
  0x25   :  { %s487_s30 = sld [smem:[#allocation5]]  ;;  %s491_s2 = sld [smem:[#allocation5 + $0x1]]  ;;  %v329_v37 = vld [vmem:[%s700_s3 + $0x30] sm:$0xff]  ;;  %v333_v46 = vld [vmem:[%s700_s3 + $0x38] sm:$0xff]  ;;  %v337_v55 = vld [vmem:[%s700_s3 + $0x40] sm:$0xff] }
  0x26   :  { %s314_s7 = sld [smem:[#allocation3 + $0x2]]  ;;  %s500_s12 = sld [smem:[#allocation3 + $0x3]] }
  0x27   :  { %s493_s8 = sld [smem:[#allocation4 + $0x2]]  ;;  %s505_s15 = sld [smem:[#allocation4 + $0x3]] }
  0x28   :  { %s498_s11 = sld [smem:[#allocation5 + $0x2]]  ;;  %s507_s16 = sld [smem:[#allocation5 + $0x3]] }
  0x29   :  { %v27_v2 = vstv %s26_s28  ;;  %s509_s17 = sld [smem:[#allocation3 + $0x4]]  ;;  %v39_v5 = vstv %s310_s5  ;;  %s518_s22 = sld [smem:[#allocation3 + $0x5]] }
  0x2a   :  { %v30_v3 = vstv %s29_s29  ;;  %s511_s18 = sld [smem:[#allocation4 + $0x4]]  ;;  %v28_v4 = vsub.f32 %v25_v0, %v27_v2  ;;  %v40_v8 = vsub.f32 %v309_v1, %v39_v5  ;;  %v42_v9 = vstv %s489_s6  ;;  %s525_s1 = sld [smem:[#allocation4 + $0x5]] }
  0x2b   :  { %s516_s21 = sld [smem:[#allocation5 + $0x4]]  ;;  %v34_v7 = vstv %s487_s30  ;;  %s527_s24 = sld [smem:[#allocation5 + $0x5]]  ;;  %v46_v12 = vstv %s491_s2 }
  0x2c   :  { %v31_v11 = vmul.f32 %v30_v3, %v28_v4  ;;  %v51_v13 = vstv %s314_s7  ;;  %s531_s25 = sld [smem:[#allocation3 + $0x6]]  ;;  %v43_v15 = vmul.f32 %v42_v9, %v40_v8  ;;  %v63_v18 = vstv %s500_s12  ;;  %s542_s30 = sld [smem:[#allocation3 + $0x7]] }
  0x2d   :  { %v54_v14 = vstv %s493_s8  ;;  %s533_s26 = sld [smem:[#allocation4 + $0x6]]  ;;  %v52_v16 = vsub.f32 %v313_v6, %v51_v13  ;;  %v64_v21 = vsub.f32 %v317_v10, %v63_v18  ;;  %v66_v22 = vstv %s505_s15  ;;  %s546_s5 = sld [smem:[#allocation4 + $0x7]] }
  0x2e   :  { %v58_v17 = vstv %s498_s11  ;;  %s540_s29 = sld [smem:[#allocation5 + $0x6]]  ;;  %v33_v20 = vmul.f32 %v31_v11, %v31_v11  ;;  %v70_v23 = vstv %s507_s16  ;;  %s548_s6 = sld [smem:[#allocation5 + $0x7]]  ;;  %v45_v24 = vmul.f32 %v43_v15, %v43_v15 }
  0x2f   :  { %v55_v25 = vmul.f32 %v54_v14, %v52_v16  ;;  %v97_v26 = vstv %s509_s17  ;;  %s555_s8 = sld [smem:[#allocation3 + $0x8]]  ;;  %v67_v30 = vmul.f32 %v66_v22, %v64_v21  ;;  %v109_v35 = vstv %s518_s22  ;;  %s573_s15 = sld [smem:[#allocation3 + $0x9]] }
  0x30   :  { %v100_v27 = vstv %s511_s18  ;;  %s557_s9 = sld [smem:[#allocation4 + $0x8]]  ;;  %v35_v29 = vsub.f32 %v34_v7, %v33_v20  ;;  %v98_v31 = vsub.f32 %v321_v19, %v97_v26  ;;  %v47_v33 = vsub.f32 %v46_v12, %v45_v24  ;;  %s581_s18 = sld [smem:[#allocation4 + $0x9]]  ;;  %v341_v12 = vld [vmem:[%s700_s3 + $0x48] sm:$0xff] }
  0x31   :  { %v104_v32 = vstv %s516_s21  ;;  %v57_v34 = vmul.f32 %v55_v25, %v55_v25  ;;  %v112_v36 = vstv %s525_s1  ;;  %v69_v38 = vmul.f32 %v67_v30, %v67_v30  ;;  %s571_s14 = sld [smem:[#allocation5 + $0x8]]  ;;  %s583_s19 = sld [smem:[#allocation5 + $0x9]] }
  0x32   :  { %v101_v39 = vmul.f32 %v100_v27, %v98_v31  ;;  %v110_v40 = vsub.f32 %v325_v28, %v109_v35  ;;  %v116_v41 = vstv %s527_s24  ;;  %v72_v43 = vmax.f32 %v35_v29, %v47_v33  ;;  %s587_s20 = sld [smem:[#allocation3 + $0xa]]  ;;  %s602_s23 = sld [smem:[#allocation3 + $0xb]]  ;;  %v345_v27 = vld [vmem:[%s700_s3 + $0x50] sm:$0xff]  ;;  %v349_v31 = vld [vmem:[%s700_s3 + $0x58] sm:$0xff] }
  0x33   :  { %v59_v42 = vsub.f32 %v58_v17, %v57_v34  ;;  %v121_v44 = vstv %s531_s25  ;;  %v124_v45 = vstv %s533_s26  ;;  %v71_v47 = vsub.f32 %v70_v23, %v69_v38  ;;  %s594_s21 = sld [smem:[#allocation4 + $0xa]]  ;;  %s608_s24 = sld [smem:[#allocation4 + $0xb]] }
  0x34   :  { %v103_v48 = vmul.f32 %v101_v39, %v101_v39  ;;  %v113_v49 = vmul.f32 %v112_v36, %v110_v40  ;;  %v122_v50 = vsub.f32 %v329_v37, %v121_v44  ;;  %v128_v52 = vstv %s540_s29  ;;  %s596_s22 = sld [smem:[#allocation5 + $0xa]]  ;;  %s611_s25 = sld [smem:[#allocation5 + $0xb]]  ;;  %v353_v39 = vld [vmem:[%s700_s3 + $0x60] sm:$0xff] }
  0x35   :  { %v73_v51 = vmax.f32 %v72_v43, %v59_v42  ;;  %v133_v53 = vstv %s542_s30  ;;  %v136_v54 = vstv %s546_s5  ;;  %v140_v61 = vstv %s548_s6  ;;  %s613_s26 = sld [smem:[#allocation3 + $0xc]]  ;;  %s629_s5 = sld [smem:[#allocation3 + $0xd]] }
  0x36   :  { %v585_v56 = vsub.f32 %v104_v32, %v103_v48  ;;  %v115_v57 = vmul.f32 %v113_v49, %v113_v49  ;;  %v125_v58 = vmul.f32 %v124_v45, %v122_v50  ;;  %v134_v59 = vsub.f32 %v333_v46, %v133_v53  ;;  %s618_s27 = sld [smem:[#allocation4 + $0xc]]  ;;  %s637_s7 = sld [smem:[#allocation4 + $0xd]] }
  0x37   :  { %v589_v60 = vmax.f32 %v73_v51, %v71_v47  ;;  %v167_v62 = vstv %s555_s8  ;;  %v170_v63 = vstv %s557_s9  ;;  %v174_v16 = vstv %s571_s14  ;;  %s627_s30 = sld [smem:[#allocation5 + $0xc]]  ;;  %s639_s8 = sld [smem:[#allocation5 + $0xd]] }
  0x38   :  { %v117_v0 = vsub.f32 %v116_v41, %v115_v57  ;;  %v127_v1 = vmul.f32 %v125_v58, %v125_v58  ;;  %v137_v2 = vmul.f32 %v136_v54, %v134_v59  ;;  %v168_v3 = vsub.f32 %v337_v55, %v167_v62  ;;  %s645_s9 = sld [smem:[#allocation3 + $0xe]]  ;;  %s656_s14 = sld [smem:[#allocation3 + $0xf]]  ;;  %v357_v57 = vld [vmem:[%s700_s3 + $0x68] sm:$0xff] }
  0x39   :  { %v75_v4 = vsub.f32 %v35_v29, %v589_v60  ;;  %v78_v5 = vsub.f32 %v47_v33, %v589_v60  ;;  %v82_v6 = vsub.f32 %v59_v42, %v589_v60  ;;  %v86_v7 = vsub.f32 %v71_v47, %v589_v60  ;;  %s647_s10 = sld [smem:[#allocation4 + $0xe]]  ;;  %s663_s16 = sld [smem:[#allocation5 + $0xf]] }
  0x3a   :  { %v129_v8 = vsub.f32 %v128_v52, %v127_v1  ;;  %v139_v9 = vmul.f32 %v137_v2, %v137_v2  ;;  %v142_v10 = vmax.f32 %v585_v56, %v117_v0  ;;  %v171_v11 = vmul.f32 %v170_v63, %v168_v3  ;;  %s654_s13 = sld [smem:[#allocation5 + $0xe]] }
  0x3b   :  { %v76_v13 = vmul.f32 1.442695, %v75_v4  ;;  %v79_v14 = vmul.f32 1.442695, %v78_v5  ;;  %v83_v15 = vmul.f32 1.442695, %v82_v6  ;;  %v179_v21 = vstv %s573_s15 }
  0x3c   :  { %v87_v17 = vmul.f32 1.442695, %v86_v7  ;;  %v141_v18 = vsub.f32 %v140_v61, %v139_v9  ;;  %v143_v19 = vmax.f32 %v142_v10, %v129_v8  ;;  %v173_v20 = vmul.f32 %v171_v11, %v171_v11  ;;  %s661_s15 = sld [smem:[#allocation4 + $0xf]]  ;;  %v361_v9 = vld [vmem:[%s700_s3 + $0x70] sm:$0xff]  ;;  %v365_v10 = vld [vmem:[%s700_s3 + $0x78] sm:$0xff] }
  0x3d   :  { %372 = vpow2.f32 %v76_v13  ;;  %v182_v22 = vstv %s581_s18  ;;  %v186_v23 = vstv %s583_s19  ;;  %v180_v26 = vsub.f32 %v341_v12, %v179_v21 }
  0x3e   :  { %374 = vpow2.f32 %v79_v14  ;;  %v620_v24 = vmax.f32 %v143_v19, %v141_v18  ;;  %v622_v25 = vsub.f32 %v174_v16, %v173_v20  ;;  %v191_v28 = vstv %s587_s20 }
  0x3f   :  { %376 = vpow2.f32 %v83_v15  ;;  %v194_v29 = vstv %s594_s21  ;;  %v198_v30 = vstv %s596_s22  ;;  %v183_v36 = vmul.f32 %v182_v22, %v180_v26 }
  0x40   :  { %378 = vpow2.f32 %v87_v17  ;;  %v145_v32 = vsub.f32 %v585_v56, %v620_v24  ;;  %v148_v33 = vsub.f32 %v117_v0, %v620_v24  ;;  %v152_v34 = vsub.f32 %v129_v8, %v620_v24 }
  0x41   :  { %v156_v35 = vsub.f32 %v141_v18, %v620_v24  ;;  %v192_v37 = vsub.f32 %v345_v27, %v191_v28  ;;  %v203_v38 = vstv %s602_s23  ;;  %v185_v45 = vmul.f32 %v183_v36, %v183_v36 }
  0x42   :  { %v146_v40 = vmul.f32 1.442695, %v145_v32  ;;  %v149_v41 = vmul.f32 1.442695, %v148_v33  ;;  %v153_v42 = vmul.f32 1.442695, %v152_v34  ;;  %v204_v43 = vsub.f32 %v349_v31, %v203_v38 }
  0x43   :  { %v157_v44 = vmul.f32 1.442695, %v156_v35  ;;  %v195_v46 = vmul.f32 %v194_v29, %v192_v37  ;;  %v206_v47 = vstv %s608_s24  ;;  %v210_v49 = vstv %s611_s25 }
  0x44   :  { %380 = vpow2.f32 %v146_v40  ;;  %v207_v48 = vmul.f32 %v206_v47, %v204_v43  ;;  %v237_v50 = vstv %s613_s26  ;;  %v187_v51 = vsub.f32 %v186_v23, %v185_v45 }
  0x45   :  { %382 = vpow2.f32 %v149_v41  ;;  %v197_v52 = vmul.f32 %v195_v46, %v195_v46  ;;  %v238_v53 = vsub.f32 %v353_v39, %v237_v50  ;;  %v240_v55 = vstv %s618_s27 }
  0x46   :  { %384 = vpow2.f32 %v153_v42  ;;  %v209_v54 = vmul.f32 %v207_v48, %v207_v48  ;;  %v244_v56 = vstv %s627_s30  ;;  %v212_v61 = vmax.f32 %v622_v25, %v187_v51 }
  0x47   :  { %v373_v58 = vpop.eup %372  ;;  %386 = vpow2.f32 %v157_v44  ;;  %v199_v59 = vsub.f32 %v198_v30, %v197_v52  ;;  %v241_v62 = vmul.f32 %v240_v55, %v238_v53  ;;  %v249_v1 = vstv %s629_s5 }
  0x48   :  { %v375_v63 = vpop.eup %374  ;;  %v211_v0 = vsub.f32 %v210_v49, %v209_v54  ;;  %v252_v2 = vstv %s637_s7  ;;  %v256_v3 = vstv %s639_s8  ;;  %v250_v8 = vsub.f32 %v357_v57, %v249_v1 }
  0x49   :  { %v377_v4 = vpop.eup %376  ;;  %v81_v5 = vadd.f32 %v375_v63, %v373_v58  ;;  %v213_v6 = vmax.f32 %v212_v61, %v199_v59  ;;  %v243_v7 = vmul.f32 %v241_v62, %v241_v62  ;;  %v261_v12 = vstv %s645_s9 }
  0x4a   :  { %v379_v11 = vpop.eup %378  ;;  %v264_v13 = vstv %s647_s10  ;;  %v268_v14 = vstv %s654_s13  ;;  %v273_v15 = vstv %s656_s14  ;;  %v253_v19 = vmul.f32 %v252_v2, %v250_v8 }
  0x4b   :  { %v85_v16 = vadd.f32 %v377_v4, %v81_v5  ;;  %v684_v17 = vmax.f32 %v213_v6, %v211_v0  ;;  %v245_v18 = vsub.f32 %v244_v56, %v243_v7  ;;  %v262_v20 = vsub.f32 %v361_v9, %v261_v12 }
  0x4c   :  { %v274_v21 = vsub.f32 %v365_v10, %v273_v15  ;;  %v276_v22 = vstv %s661_s15  ;;  %v280_v23 = vstv %s663_s16  ;;  %v255_v32 = vmul.f32 %v253_v19, %v253_v19 }
  0x4d   :  { %v89_v26 = vadd.f32 %v379_v11, %v85_v16  ;;  %v215_v27 = vsub.f32 %v622_v25, %v684_v17  ;;  %v218_v28 = vsub.f32 %v187_v51, %v684_v17  ;;  %v222_v29 = vsub.f32 %v199_v59, %v684_v17 }
  0x4e   :  { %v381_v30 = vpop.eup %380  ;;  %v226_v31 = vsub.f32 %v211_v0, %v684_v17  ;;  %v265_v33 = vmul.f32 %v264_v13, %v262_v20  ;;  %v277_v34 = vmul.f32 %v276_v22, %v274_v21  ;;  %v257_v42 = vsub.f32 %v256_v3, %v255_v32 }
  0x4f   :  { %v383_v35 = vpop.eup %382  ;;  %388 = vlog2.f32 %v89_v26  ;;  %v216_v36 = vmul.f32 1.442695, %v215_v27  ;;  %v219_v37 = vmul.f32 1.442695, %v218_v28  ;;  %v223_v38 = vmul.f32 1.442695, %v222_v29 }
  0x50   :  { %v385_v39 = vpop.eup %384  ;;  %v151_v40 = vadd.f32 %v383_v35, %v381_v30  ;;  %v227_v41 = vmul.f32 1.442695, %v226_v31  ;;  %v267_v25 = vmul.f32 %v265_v33, %v265_v33  ;;  %v279_v44 = vmul.f32 %v277_v34, %v277_v34 }
  0x51   :  { %v387_v43 = vpop.eup %386  ;;  %390 = vpow2.f32 %v216_v36  ;;  %v282_v47 = vmax.f32 %v245_v18, %v257_v42 }
  0x52   :  { %v155_v45 = vadd.f32 %v385_v39, %v151_v40  ;;  %392 = vpow2.f32 %v219_v37  ;;  %v269_v46 = vsub.f32 %v268_v14, %v267_v25  ;;  %v281_v48 = vsub.f32 %v280_v23, %v279_v44 }
  0x53   :  { %394 = vpow2.f32 %v223_v38 }
  0x54   :  { %396 = vpow2.f32 %v227_v41  ;;  %v283_v49 = vmax.f32 %v282_v47, %v269_v46  ;;  %v159_v50 = vadd.f32 %v387_v43, %v155_v45 }
  0x56   :  { %v284_v51 = vmax.f32 %v283_v49, %v281_v48  ;;  %398 = vlog2.f32 %v159_v50 }
  0x58   :  { %v285_v52 = vsub.f32 %v245_v18, %v284_v51  ;;  %v288_v53 = vsub.f32 %v257_v42, %v284_v51  ;;  %v292_v54 = vsub.f32 %v269_v46, %v284_v51  ;;  %v296_v55 = vsub.f32 %v281_v48, %v284_v51 }
  0x59   :  { %v389_v56 = vpop.eup %388 }
  0x5a   :  { %v286_v57 = vmul.f32 1.442695, %v285_v52  ;;  %v289_v58 = vmul.f32 1.442695, %v288_v53  ;;  %v293_v61 = vmul.f32 1.442695, %v292_v54 }
  0x5b   :  { %v391_v59 = vpop.eup %390  ;;  %v297_v62 = vmul.f32 1.442695, %v296_v55  ;;  %v92_v3 = vmul.f32 0.6931472, %v389_v56 }
  0x5c   :  { %v393_v63 = vpop.eup %392  ;;  %400 = vpow2.f32 %v286_v57 }
  0x5d   :  { %v395_v0 = vpop.eup %394  ;;  %v221_v1 = vadd.f32 %v393_v63, %v391_v59  ;;  %402 = vpow2.f32 %v289_v58  ;;  %v93_v6 = vadd.f32 %v92_v3, %v589_v60 }
  0x5e   :  { %v397_v2 = vpop.eup %396  ;;  %404 = vpow2.f32 %v293_v61 }
  0x5f   :  { %v225_v4 = vadd.f32 %v395_v0, %v221_v1  ;;  %406 = vpow2.f32 %v297_v62  ;;  %v160_v10 = vadd.f32 %v620_v24, %v93_v6 }
  0x60   :  { %v399_v7 = vpop.eup %398 }
  0x61   :  { %v229_v5 = vadd.f32 %v397_v2, %v225_v4  ;;  %v162_v11 = vmul.f32 0.6931472, %v399_v7 }
  0x63   :  { %408 = vlog2.f32 %v229_v5  ;;  %v163_v16 = vadd.f32 %v162_v11, %v160_v10 }
  0x65   :  { %v230_v20 = vadd.f32 %v684_v17, %v163_v16 }
  0x66   :  { %v401_v8 = vpop.eup %400 }
  0x67   :  { %v403_v9 = vpop.eup %402 }
  0x68   :  { %v405_v12 = vpop.eup %404  ;;  %v291_v13 = vadd.f32 %v403_v9, %v401_v8 }
  0x69   :  { %v407_v14 = vpop.eup %406 }
  0x6a   :  { %v295_v15 = vadd.f32 %v405_v12, %v291_v13 }
  0x6c   :  { %v299_v18 = vadd.f32 %v407_v14, %v295_v15 }
  0x6d   :  { %v409_v19 = vpop.eup %408 }
  0x6e   :  { %410 = vlog2.f32 %v299_v18  ;;  %v232_v21 = vmul.f32 0.6931472, %v409_v19 }
  0x70   :  { %v233_v22 = vadd.f32 %v232_v21, %v230_v20 }
  0x72   :  { %v300_v60 = vadd.f32 %v284_v51, %v233_v22 }
  0x78   :  { %v411_v23 = vpop.eup %410 }
  0x79   :  { %v302_v26 = vmul.f32 0.6931472, %v411_v23 }
  0x7b   :  { %v303_v27 = vadd.f32 %v302_v26, %v300_v60 }
  0x7d   :  { %304 = vst [vmem:[%s701_s4] sm:$0xff] %v303_v27 }

</bundles_post_ra>
